<compile_context>
chip_gen: v7x
topology: tpu7x:2x2x1
jax: 0.10.0
libtpu: 0.0.40
codegen_flags: <defaults>
</compile_context>

<pallas_src>
import jax
import jax.numpy as jnp
from jax.experimental import pallas as pl
from jax.experimental.pallas import tpu as pltpu


def _pointer_net_kernel(emb_ref, w_ref, b_ref, out_ref):
    """One grid step == Bb batch elements.

    emb_ref : (Bb, S, H)    encoder output tile (bf16 or f32)
    w_ref   : (H, L+1)      fused [pointer_danse.weight^T | cls_dense.weight^T]
    b_ref   : (1, L+1)      fused [pointer_danse.bias | cls_dense.bias], f32
    out_ref : (Bb, S, L)    pointer output tile, f32
    """
    bb, s, h = emb_ref.shape
    lp1 = w_ref.shape[1]
    l = lp1 - 1

    # Single 2-D MXU matmul over all Bb*S tokens; accumulate in f32.
    emb2d = emb_ref[...].reshape(bb * s, h)
    logits = (
        jnp.dot(emb2d, w_ref[...], preferred_element_type=jnp.float32)
        + b_ref[...]
    )                                              # (Bb*S, L+1) f32
    logits3 = logits.reshape(bb, s, lp1)           # (Bb, S, L+1)

    # event_detector = sigmoid(CLS-token logit) per batch element -> (Bb, 1, 1)
    det = jax.nn.sigmoid(logits3[:, 0:1, l:lp1])

    # pointer = sigmoid(token logits) -> (Bb, S, L), scaled by the detector.
    pointer = jax.nn.sigmoid(logits3[:, :, :l])
    out_ref[...] = (pointer * det).astype(out_ref.dtype)


def _pick_block_batch(B, S, H, itemsize, max_buffer_bytes=4 * 1024 * 1024):
    """Largest divisor of B whose (Bb, S, H) tile fits in max_buffer_bytes.

    4 MiB per buffer => ~8 MiB double-buffered input, comfortably inside the
    v5e 16 MiB default scoped VMEM and the v7x 64 MiB physical VMEM.
    """
    cap = max(1, max_buffer_bytes // (S * H * itemsize))
    bb = int(min(B, cap))
    while B % bb:
        bb -= 1
    return bb


def pointer_net_forward(embedding, wc, bc, wp, bp, *, compute_dtype=jnp.bfloat16):
    """embedding: (B, S, H); returns (B, S, L) float32.

    Pass the encoder output already in `compute_dtype` (bf16) to avoid an
    extra HBM cast pass — the kernel is bound by reading this tensor.
    """
    B, S, H = embedding.shape
    L = wp.shape[1]

    emb = embedding.astype(compute_dtype)
    # Fused projection: columns [0:L] = pointer_danse, column L = cls_dense.
    w_fused = jnp.concatenate([wp, wc], axis=1).astype(compute_dtype)         # (H, L+1)
    b_fused = (
        jnp.concatenate([bp.reshape(-1), bc.reshape(-1)])
        .reshape(1, L + 1)
        .astype(jnp.float32)
    )

    bb = _pick_block_batch(B, S, H, jnp.dtype(compute_dtype).itemsize)

    return pl.pallas_call(
        _pointer_net_kernel,
        out_shape=jax.ShapeDtypeStruct((B, S, L), jnp.float32),
        grid_spec=pltpu.PrefetchScalarGridSpec(
            num_scalar_prefetch=0,
            grid=(B // bb,),
            in_specs=[
                pl.BlockSpec((bb, S, H), lambda b: (b, 0, 0)),   # embedding tile
                pl.BlockSpec((H, L + 1), lambda b: (0, 0)),      # fused W (fetched once)
                pl.BlockSpec((1, L + 1), lambda b: (0, 0)),      # fused bias (fetched once)
            ],
            out_specs=pl.BlockSpec((bb, S, L), lambda b: (b, 0, 0)),
        ),
        compiler_params=pltpu.CompilerParams(
            dimension_semantics=("parallel",),        # v7x: shard batch over both TCs
            vmem_limit_bytes=32 * 1024 * 1024,        # explicit scoped-VMEM budget
        ),
    )(emb, w_fused, b_fused)


def pointer_net_reference(embedding, wc, bc, wp, bp):
    """Plain-JAX reference mirroring the PyTorch forward (eval mode), in f32."""
    emb = embedding.astype(jnp.float32)
    wc = wc.astype(jnp.float32)
    wp = wp.astype(jnp.float32)
    bc = bc.astype(jnp.float32)
    bp = bp.astype(jnp.float32)
    event_detector = jax.nn.sigmoid(emb[:, 0] @ wc + bc)      # (B, 1)
    event_detector = event_detector[:, None, :]               # (B, 1, 1)
    pointer = jax.nn.sigmoid(emb @ wp + bp)                   # (B, S, L)
    return pointer * event_detector


if __name__ == "__main__":
    # Small, forward-consistent shapes.
    B, S, H, L = 2, 8, 32, 4   # batch, seq, hidden, label_categories_num

    key = jax.random.PRNGKey(0)
    k_emb, k_wc, k_bc, k_wp, k_bp = jax.random.split(key, 5)

    # Synthetic "encoder output" already in bf16 (the HBM-bound input) and
    # linear-layer parameters.
    embedding = jax.random.normal(k_emb, (B, S, H), dtype=jnp.float32).astype(jnp.bfloat16)
    wc = (jax.random.normal(k_wc, (H, 1), dtype=jnp.float32) * 0.05).astype(jnp.bfloat16)
    bc = jax.random.normal(k_bc, (1,), dtype=jnp.float32) * 0.05
    wp = (jax.random.normal(k_wp, (H, L), dtype=jnp.float32) * 0.05).astype(jnp.bfloat16)
    bp = jax.random.normal(k_bp, (L,), dtype=jnp.float32) * 0.05

    out = jax.block_until_ready(pointer_net_forward(embedding, wc, bc, wp, bp))

    ref = pointer_net_reference(embedding, wc, bc, wp, bp)
    assert out.shape == (B, S, L), out.shape
    assert jnp.allclose(out, ref, atol=1e-3, rtol=1e-3), "mismatch vs reference"

    print("KERNEL_OK")
</pallas_src>

<mosaic_0001>
module attributes {stable_mosaic.version = 11 : i64} {
  func.func @_pointer_net_kernel(%arg0: i32, %arg1: memref<2x8x32xbf16, #tpu.memory_space<vmem>>, %arg2: memref<32x5xbf16, #tpu.memory_space<vmem>>, %arg3: memref<1x5xf32, #tpu.memory_space<vmem>>, %arg4: memref<2x8x4xf32, #tpu.memory_space<vmem>>) attributes {dimension_semantics = [#tpu.dimension_semantics<parallel>], iteration_bounds = array<i64: 1>, scalar_prefetch = 0 : i64, scratch_operands = 0 : i64, tpu.core_type = #tpu.core_type<tc>, window_params = [{transform_indices = @transform_0, window_bounds = array<i64: 2, 8, 32>}, {pipeline_mode = #tpu.pipeline_mode<synchronous>, transform_indices = @transform_1, window_bounds = array<i64: 32, 5>}, {pipeline_mode = #tpu.pipeline_mode<synchronous>, transform_indices = @transform_2, window_bounds = array<i64: 1, 5>}, {transform_indices = @transform_3, window_bounds = array<i64: 2, 8, 4>}]} {
    %c0 = arith.constant 0 : index
    %c0_0 = arith.constant 0 : index
    %c0_1 = arith.constant 0 : index
    %0 = vector.load %arg1[%c0, %c0_0, %c0_1] : memref<2x8x32xbf16, #tpu.memory_space<vmem>>, vector<2x8x32xbf16>
    %1 = vector.shape_cast %0 : vector<2x8x32xbf16> to vector<16x32xbf16>
    %c0_2 = arith.constant 0 : index
    %c0_3 = arith.constant 0 : index
    %2 = vector.load %arg2[%c0_2, %c0_3] : memref<32x5xbf16, #tpu.memory_space<vmem>>, vector<32x5xbf16>
    %cst = arith.constant dense<0.000000e+00> : vector<16x5xf32>
    %3 = tpu.matmul %1, %2, %cst {dimension_numbers = #tpu.dot_dimension_numbers<[1], [0], [0], [1], [0, 0, 1, 1], [], []>} : vector<16x32xbf16>, vector<32x5xbf16>, vector<16x5xf32> -> vector<16x5xf32>
    %c0_4 = arith.constant 0 : index
    %c0_5 = arith.constant 0 : index
    %4 = vector.load %arg3[%c0_4, %c0_5] : memref<1x5xf32, #tpu.memory_space<vmem>>, vector<1x5xf32>
    %5 = vector.broadcast %4 : vector<1x5xf32> to vector<16x5xf32>
    %6 = arith.addf %3, %5 : vector<16x5xf32>
    %7 = vector.shape_cast %6 : vector<16x5xf32> to vector<2x8x5xf32>
    %8 = vector.extract_strided_slice %7 {offsets = [0, 0, 4], sizes = [2, 1, 1], strides = [1, 1, 1]} : vector<2x8x5xf32> to vector<2x1x1xf32>
    %9 = arith.negf %8 : vector<2x1x1xf32>
    %10 = math.exp %9 : vector<2x1x1xf32>
    %cst_6 = arith.constant 1.000000e+00 : f32
    %11 = vector.broadcast %cst_6 : f32 to vector<2x1x1xf32>
    %12 = arith.addf %11, %10 : vector<2x1x1xf32>
    %13 = arith.divf %11, %12 : vector<2x1x1xf32>
    %14 = vector.extract_strided_slice %7 {offsets = [0, 0, 0], sizes = [2, 8, 4], strides = [1, 1, 1]} : vector<2x8x5xf32> to vector<2x8x4xf32>
    %15 = arith.negf %14 : vector<2x8x4xf32>
    %16 = math.exp %15 : vector<2x8x4xf32>
    %cst_7 = arith.constant 1.000000e+00 : f32
    %17 = vector.broadcast %cst_7 : f32 to vector<2x8x4xf32>
    %18 = arith.addf %17, %16 : vector<2x8x4xf32>
    %19 = arith.divf %17, %18 : vector<2x8x4xf32>
    %20 = vector.broadcast %13 : vector<2x1x1xf32> to vector<2x8x4xf32>
    %21 = arith.mulf %19, %20 : vector<2x8x4xf32>
    %c0_8 = arith.constant 0 : index
    %c0_9 = arith.constant 0 : index
    %c0_10 = arith.constant 0 : index
    %22 = vector.load %arg4[%c0_8, %c0_9, %c0_10] : memref<2x8x4xf32, #tpu.memory_space<vmem>>, vector<2x8x4xf32>
    tpu.vector_store %arg4[%c0_8, %c0_9, %c0_10], %21 {strides = array<i32>} : memref<2x8x4xf32, #tpu.memory_space<vmem>>, vector<2x8x4xf32>,
    return
  }
  func.func @transform_0(%arg0: i32) -> (i32, i32, i32) {
    %c0_i32 = arith.constant 0 : i32
    %c0_i32_0 = arith.constant 0 : i32
    %c0_i32_1 = arith.constant 0 : i32
    return %arg0, %c0_i32, %c0_i32_0 : i32, i32, i32
  }
  func.func @transform_1(%arg0: i32) -> (i32, i32) {
    %c0_i32 = arith.constant 0 : i32
    %c0_i32_0 = arith.constant 0 : i32
    %c0_i32_1 = arith.constant 0 : i32
    return %c0_i32, %c0_i32_0 : i32, i32
  }
  func.func @transform_2(%arg0: i32) -> (i32, i32) {
    %c0_i32 = arith.constant 0 : i32
    %c0_i32_0 = arith.constant 0 : i32
    %c0_i32_1 = arith.constant 0 : i32
    return %c0_i32, %c0_i32_0 : i32, i32
  }
  func.func @transform_3(%arg0: i32) -> (i32, i32, i32) {
    %c0_i32 = arith.constant 0 : i32
    %c0_i32_0 = arith.constant 0 : i32
    %c0_i32_1 = arith.constant 0 : i32
    return %arg0, %c0_i32, %c0_i32_0 : i32, i32, i32
  }
}

</mosaic_0001>

<bundles_post_ra>
// kernel: tpu_custom_call.1
= control target key start
LH: loop header
LB: loop body
LE: loop exit
PB: predicated region body
PF: predicated region fallthrough
CT: control target
= control target key end

     0   :  { %v159_v0 = vmov 0.0   ;;  %vm160_vm0 = vmmov 0   ;;  %vm45_vm1 = vcmask 261120   ;;  %vm116_vm2 = vcmask 31744   ;;  %s200_s1 = inlined_call_operand.vmem [shape: bf16[32,5], index: 1, kind: input, shape index: {}]   ;;  %s201_s0 = inlined_call_operand.vmem [shape: bf16[2,8,32], index: 0, kind: input, shape index: {}]   ;;  %s202_s2 = inlined_call_operand.vmem [shape: f32[1,5], index: 2, kind: input, shape index: {}]   ;;  %s203_s3 = inlined_call_operand.vmem [shape: f32[2,8,4], index: 3, kind: output, shape index: {}]  }
   0x1   :  { %133 = vmatprep.subr.bf16.mxu0 %v159_v0  ;;  %v148_v1 = vld [vmem:[%s200_s1] sm:$0xff]   ;;  %137 = vmatprep.mubr.msk.bf16.mxu0 %vm160_vm0, %v159_v0  ;;  %v149_v2 = vld [vmem:[%s200_s1 + $0x8] sm:$0xff]  }
   0x2   :  { %134 = vmatpush3.bf16.msra.mxu0 %v148_v1  ;;  %v150_v3 = vld [vmem:[%s201_s0] sm:$0xff]   ;;  %s161_s0 = smov 124  }
   0x3   :  { %135 = vmatprep.subr.bf16.mxu0 %v159_v0  ;;  %v123_v4 = vld [vmem:[%s202_s2] ss:$0 sm:$0xff] }
   0x6   :  { %136 = vmatpush3.bf16.msra.mxu0 %v149_v2 }
   0x9   :  { %138 = vmatmul.mubr.msk.bf16.vlgmr.msra.gmra.mrb[0].mxu0 %vm45_vm1, %v150_v3 }
  0xdc   :  { %v83_v5 = vpop.f32.mrb[0].mxu0 }
  0xdd   :  { %v84_v6 = vadd.f32 %v123_v4, %v83_v5  ;;  %v139_v7 = vpop.f32.mrb[1].mxu0 }
  0xde   :  { %v86_v8 = vpop.f32.mrb[2].mxu0 }
  0xdf   :  { %v128_v9 = vmul.f32 -1.442695, %v84_v6  ;;  %v87_v10 = vadd.f32 %v123_v4, %v86_v8  ;;  %v140_v11 = vpop.f32.mrb[3].mxu0 }
  0xe1   :  { %151 = vpow2.f32 %v128_v9  ;;  %v129_v12 = vmul.f32 -1.442695, %v87_v10 }
  0xe3   :  { %153 = vpow2.f32 %v129_v12 }
  0xeb   :  { %v152_v13 = vpop.eup %151 }
  0xec   :  { %v96_v14 = vadd.f32 1.0, %v152_v13 }
  0xed   :  { %v154_v15 = vpop.eup %153 }
  0xee   :  { %155 = vrcp.f32 %v96_v14  ;;  %v97_v16 = vadd.f32 1.0, %v154_v15 }
  0xf0   :  { %157 = vrcp.f32 %v97_v16 }
  0xf8   :  { %v156_v17 = vpop.eup %155 }
  0xf9   :  { %104 = vrot.lane.b32.xlu0 %v156_v17, %s161_s0 }
  0xfa   :  { %v158_v18 = vpop.eup %157 }
  0xfd   :  { %106 = vrot.lane.b32.xlu0 %v158_v18, %s161_s0 }
 0x16b   :  { %v105_v19 = vpop.permute.xlu0 %104 }
 0x16c   :  { %141 = vpush %v105_v19 }
 0x16f   :  { %v107_v20 = vpop.permute.xlu0 %106 }
 0x170   :  { %143 = vpush %v107_v20 }
 0x19d   :  { %s142_s1 = spop %141 }
 0x19e   :  { %v109_v21 = vstv %s142_s1 }
 0x19f   :  { %v114_v22 = vmul.f32 %v156_v17, %v109_v21 }
 0x1a1   :  { %117 = vst.msk [vmem:[%s203_s3] sm:$0xff] %vm116_vm2, %v114_v22  ;;  %s144_s21 = spop %143 }
 0x1a2   :  { %v112_v23 = vstv %s144_s21 }
 0x1a3   :  { %v115_v24 = vmul.f32 %v158_v18, %v112_v23 }
 0x1a5   :  { %118 = vst.msk [vmem:[%s203_s3 + $0x8] sm:$0xff] %vm116_vm2, %v115_v24 }

</bundles_post_ra>
